<compile_context>
chip_gen: v6e
topology: v6e:2x2x1
jax: 0.10.0
libtpu: 0.0.40
codegen_flags: <defaults>
</compile_context>

<pallas_src>
import functools

import jax
import jax.numpy as jnp
from jax.experimental import pallas as pl
from jax.experimental.pallas import tpu as pltpu


def _round_up(x, m):
    return ((x + m - 1) // m) * m


def _pick_tile(padded_dim, target, base):
    """Largest multiple of `base` that divides `padded_dim` and is <= target."""
    if padded_dim <= target:
        return padded_dim
    best = base
    t = base
    while t <= target:
        if padded_dim % t == 0:
            best = t
        t += base
    return best


def _linear_kernel(x_ref, w_ref, b_ref, o_ref, *,
                   use_softplus, clip, min_val, max_val, compute_dtype):
    k = pl.program_id(2)
    nk = pl.num_programs(2)

    x_t = x_ref[...]
    w_t = w_ref[...]
    if jnp.dtype(compute_dtype) != jnp.dtype(jnp.float32):
        x_t = x_t.astype(compute_dtype)
        w_t = w_t.astype(compute_dtype)

    # Canonical (tm,tk) @ (tk,tn) -> f32 accumulation on the MXU.
    partial = jnp.dot(x_t, w_t, preferred_element_type=jnp.float32)

    # Output block is resident across k: accumulate straight into o_ref.
    @pl.when(k == 0)
    def _first():
        o_ref[...] = partial

    @pl.when(k != 0)
    def _accumulate():
        o_ref[...] += partial

    @pl.when(k == nk - 1)
    def _epilogue():
        out = o_ref[...] + b_ref[...]          # (tm, tn) + (1, tn)

        if use_softplus:
            # nn.Softplus(beta=1, threshold=20); clamp the exp argument so the
            # EUP never evaluates exp on values the select throws away.
            sp = jnp.where(out > 20.0, out,
                           jnp.log1p(jnp.exp(jnp.minimum(out, 20.0))))
            out = sp + jnp.float32(min_val)

        if clip:
            out = jnp.clip(out, jnp.float32(min_val), jnp.float32(max_val))

        o_ref[...] = out


def linear_forward(x, weight, bias, *, use_softplus=True, clip=True,
                   min_val=0.01, max_val=100.0,
                   tm_target=512, tn_target=512, tk_target=1024,
                   compute_dtype=jnp.float32):
    """Pallas forward pass for the PyTorch `Linear` module.

    x:      [B, input_dim]   float32
    weight: [output_dim, input_dim]
    bias:   [output_dim]
    returns [B, output_dim] float32
    """
    x = x.astype(jnp.float32)
    weight = weight.astype(jnp.float32)
    bias = bias.astype(jnp.float32)

    B, d_in = x.shape
    d_out, d_in_w = weight.shape
    assert d_in == d_in_w
    assert bias.shape == (d_out,)

    # --- Pad ONLY to hardware minimums (B -> 8 sublane, d_in/d_out -> 128 lane) ---
    B_pad = _round_up(B, 8)
    K_pad = _round_up(d_in, 128)
    N_pad = _round_up(d_out, 128)

    # Transpose weight once in the wrapper -> canonical (K, N) layout.
    w_t = weight.T                                   # (d_in, d_out)

    x_p = x
    if (B_pad, K_pad) != (B, d_in):
        x_p = jnp.pad(x, ((0, B_pad - B), (0, K_pad - d_in)))
    w_p = w_t
    if (K_pad, N_pad) != (d_in, d_out):
        w_p = jnp.pad(w_t, ((0, K_pad - d_in), (0, N_pad - d_out)))
    b_p = bias
    if N_pad != d_out:
        b_p = jnp.pad(bias, (0, N_pad - d_out))
    b2d = b_p.reshape(1, N_pad)

    # --- Per-generation VMEM budget & tile selection -------------------------
    try:
        vmem_cap = int(pltpu.get_tpu_info().vmem_capacity_bytes)
    except Exception:
        vmem_cap = 64 << 20                          # conservative fallback
    budget = max(int(vmem_cap * 0.45), 12 << 20)     # leave ample headroom

    tm = _pick_tile(B_pad, tm_target, 8)
    tn = _pick_tile(N_pad, tn_target, 128)
    tk = _pick_tile(K_pad, tk_target, 128)

    itemsize = 4  # f32 everywhere in HBM/VMEM

    def working_set(_tm, _tn, _tk):
        # double-buffered x & w tiles, double-buffered output block, bias.
        return (2 * (_tm * _tk + _tk * _tn) + 2 * _tm * _tn + 2 * _tn) * itemsize

    # Shrink tk, then tn, then tm until the working set fits the budget.
    while working_set(tm, tn, tk) > budget and tk > 128:
        tk = max(128, _pick_tile(K_pad, tk // 2, 128))
    while working_set(tm, tn, tk) > budget and tn > 128:
        tn = max(128, _pick_tile(N_pad, tn // 2, 128))
    while working_set(tm, tn, tk) > budget and tm > 8:
        tm = max(8, _pick_tile(B_pad, tm // 2, 8))

    # v7x has 2 TensorCores: make sure the "parallel" axes expose >= 2 blocks
    # whenever the padded shape allows it.
    if (B_pad // tm) * (N_pad // tn) == 1:
        if N_pad // 128 >= 2:
            tn = _pick_tile(N_pad, N_pad // 2, 128)
        elif B_pad // 8 >= 2:
            tm = _pick_tile(B_pad, B_pad // 2, 8)

    grid = (B_pad // tm, N_pad // tn, K_pad // tk)

    ws = working_set(tm, tn, tk)
    vmem_limit = int(min(vmem_cap - (8 << 20), max(2 * ws, 32 << 20)))

    kernel = functools.partial(
        _linear_kernel,
        use_softplus=use_softplus,
        clip=clip,
        min_val=float(min_val),
        max_val=float(max_val),
        compute_dtype=compute_dtype,
    )

    cost = pl.CostEstimate(
        flops=int(2 * B_pad * K_pad * N_pad),
        transcendentals=int(2 * B_pad * N_pad) if use_softplus else 0,
        bytes_accessed=int(itemsize * (B_pad * K_pad + K_pad * N_pad
                                       + N_pad + B_pad * N_pad)),
    )

    out_padded = pl.pallas_call(
        kernel,
        out_shape=jax.ShapeDtypeStruct((B_pad, N_pad), jnp.float32),
        grid_spec=pltpu.PrefetchScalarGridSpec(
            num_scalar_prefetch=0,
            grid=grid,
            in_specs=[
                pl.BlockSpec((tm, tk), lambda i, j, k: (i, k)),   # x
                pl.BlockSpec((tk, tn), lambda i, j, k: (k, j)),   # weight^T
                pl.BlockSpec((1, tn), lambda i, j, k: (0, j)),    # bias
            ],
            out_specs=pl.BlockSpec((tm, tn), lambda i, j, k: (i, j)),
        ),
        compiler_params=pltpu.CompilerParams(
            dimension_semantics=("parallel", "parallel", "arbitrary"),
            vmem_limit_bytes=vmem_limit),
        cost_estimate=cost,
    )(x_p, w_p, b2d)

    return out_padded[:B, :d_out]


if __name__ == "__main__":
    params = {
        "input_dim": 32,
        "output_dim": 16,
        "use_softplus": True,
        "clip": True,
        "min_val": 0.01,
        "max_val": 100.0,
    }

    key = jax.random.PRNGKey(0)
    kx, kw, kb = jax.random.split(key, 3)

    batch = 8
    x = jax.random.normal(kx, (batch, params["input_dim"]), dtype=jnp.float32)

    # Deterministic params mimicking nn.Linear's uniform(-1/sqrt(fan_in), +).
    bound = 1.0 / (params["input_dim"] ** 0.5)
    weight = jax.random.uniform(
        kw, (params["output_dim"], params["input_dim"]),
        minval=-bound, maxval=bound, dtype=jnp.float32)
    bias = jax.random.uniform(
        kb, (params["output_dim"],),
        minval=-bound, maxval=bound, dtype=jnp.float32)

    out = linear_forward(
        x, weight, bias,
        use_softplus=params["use_softplus"],
        clip=params["clip"],
        min_val=params["min_val"],
        max_val=params["max_val"],
    )
    jax.block_until_ready(out)

    # Plain-JAX reference (matches torch: Linear -> Softplus(1)+min_val -> clamp).
    ref = x @ weight.T + bias
    ref = jnp.where(ref > 20.0, ref,
                    jnp.log1p(jnp.exp(jnp.minimum(ref, 20.0)))) + params["min_val"]
    ref = jnp.clip(ref, params["min_val"], params["max_val"])

    assert out.shape == (batch, params["output_dim"])
    assert jnp.allclose(out, ref, atol=1e-5, rtol=1e-5)

    print("KERNEL_OK")
</pallas_src>

<mosaic_0001>
module attributes {stable_mosaic.version = 11 : i64} {
  func.func @_linear_kernel(%arg0: i32, %arg1: i32, %arg2: i32, %arg3: memref<8x128xf32, #tpu.memory_space<vmem>>, %arg4: memref<128x128xf32, #tpu.memory_space<vmem>>, %arg5: memref<1x128xf32, #tpu.memory_space<vmem>>, %arg6: memref<8x128xf32, #tpu.memory_space<vmem>>) attributes {dimension_semantics = [#tpu.dimension_semantics<parallel>, #tpu.dimension_semantics<parallel>, #tpu.dimension_semantics<arbitrary>], iteration_bounds = array<i64: 1, 1, 1>, scalar_prefetch = 0 : i64, scratch_operands = 0 : i64, tpu.core_type = #tpu.core_type<tc>, window_params = [{transform_indices = @transform_0, window_bounds = array<i64: 8, 128>}, {transform_indices = @transform_1, window_bounds = array<i64: 128, 128>}, {transform_indices = @transform_2, window_bounds = array<i64: 1, 128>}, {transform_indices = @transform_3, window_bounds = array<i64: 8, 128>}]} {
    %c0 = arith.constant 0 : index
    %c0_0 = arith.constant 0 : index
    %0 = vector.load %arg3[%c0, %c0_0] : memref<8x128xf32, #tpu.memory_space<vmem>>, vector<8x128xf32>
    %c0_1 = arith.constant 0 : index
    %c0_2 = arith.constant 0 : index
    %1 = vector.load %arg4[%c0_1, %c0_2] : memref<128x128xf32, #tpu.memory_space<vmem>>, vector<128x128xf32>
    %cst = arith.constant dense<0.000000e+00> : vector<8x128xf32>
    %2 = tpu.matmul %0, %1, %cst {dimension_numbers = #tpu.dot_dimension_numbers<[1], [0], [0], [1], [0, 0, 1, 1], [], []>} : vector<8x128xf32>, vector<128x128xf32>, vector<8x128xf32> -> vector<8x128xf32>
    %c0_i32 = arith.constant 0 : i32
    %3 = arith.cmpi eq, %arg2, %c0_i32 : i32
    %4 = arith.extui %3 : i1 to i32
    %c0_i32_3 = arith.constant 0 : i32
    %5 = arith.cmpi ne, %4, %c0_i32_3 : i32
    scf.if %5 {
      %c0_8 = arith.constant 0 : index
      %c0_9 = arith.constant 0 : index
      %12 = vector.load %arg6[%c0_8, %c0_9] : memref<8x128xf32, #tpu.memory_space<vmem>>, vector<8x128xf32>
      tpu.vector_store %arg6[%c0_8, %c0_9], %2 {strides = array<i32>} : memref<8x128xf32, #tpu.memory_space<vmem>>, vector<8x128xf32>,
    } else {
    }
    %c0_i32_4 = arith.constant 0 : i32
    %6 = arith.cmpi ne, %arg2, %c0_i32_4 : i32
    %7 = arith.extui %6 : i1 to i32
    %c0_i32_5 = arith.constant 0 : i32
    %8 = arith.cmpi ne, %7, %c0_i32_5 : i32
    scf.if %8 {
      %c0_8 = arith.constant 0 : index
      %c0_9 = arith.constant 0 : index
      %12 = vector.load %arg6[%c0_8, %c0_9] : memref<8x128xf32, #tpu.memory_space<vmem>>, vector<8x128xf32>
      %13 = arith.addf %12, %2 : vector<8x128xf32>
      %c0_10 = arith.constant 0 : index
      %c0_11 = arith.constant 0 : index
      %14 = vector.load %arg6[%c0_10, %c0_11] : memref<8x128xf32, #tpu.memory_space<vmem>>, vector<8x128xf32>
      tpu.vector_store %arg6[%c0_10, %c0_11], %13 {strides = array<i32>} : memref<8x128xf32, #tpu.memory_space<vmem>>, vector<8x128xf32>,
    } else {
    }
    %c0_i32_6 = arith.constant 0 : i32
    %9 = arith.cmpi eq, %arg2, %c0_i32_6 : i32
    %10 = arith.extui %9 : i1 to i32
    %c0_i32_7 = arith.constant 0 : i32
    %11 = arith.cmpi ne, %10, %c0_i32_7 : i32
    scf.if %11 {
      %c0_8 = arith.constant 0 : index
      %c0_9 = arith.constant 0 : index
      %12 = vector.load %arg6[%c0_8, %c0_9] : memref<8x128xf32, #tpu.memory_space<vmem>>, vector<8x128xf32>
      %c0_10 = arith.constant 0 : index
      %c0_11 = arith.constant 0 : index
      %13 = vector.load %arg5[%c0_10, %c0_11] : memref<1x128xf32, #tpu.memory_space<vmem>>, vector<1x128xf32>
      %14 = vector.broadcast %13 : vector<1x128xf32> to vector<8x128xf32>
      %15 = arith.addf %12, %14 : vector<8x128xf32>
      %cst_12 = arith.constant 2.000000e+01 : f32
      %16 = vector.broadcast %cst_12 : f32 to vector<8x128xf32>
      %17 = arith.cmpf ogt, %15, %16 : vector<8x128xf32>
      %cst_13 = arith.constant 2.000000e+01 : f32
      %18 = vector.broadcast %cst_13 : f32 to vector<8x128xf32>
      %19 = arith.minimumf %15, %18 : vector<8x128xf32>
      %20 = math.exp %19 : vector<8x128xf32>
      %21 = math.log1p %20 : vector<8x128xf32>
      %22 = arith.select %17, %15, %21 : vector<8x128xi1>, vector<8x128xf32>
      %cst_14 = arith.constant 0.00999999977 : f32
      %23 = vector.broadcast %cst_14 : f32 to vector<8x128xf32>
      %24 = arith.addf %22, %23 : vector<8x128xf32>
      %cst_15 = arith.constant 0.00999999977 : f32
      %cst_16 = arith.constant 1.000000e+02 : f32
      %25 = vector.broadcast %cst_15 : f32 to vector<8x128xf32>
      %26 = arith.maximumf %25, %24 : vector<8x128xf32>
      %27 = vector.broadcast %cst_16 : f32 to vector<8x128xf32>
      %28 = arith.minimumf %27, %26 : vector<8x128xf32>
      %c0_17 = arith.constant 0 : index
      %c0_18 = arith.constant 0 : index
      %29 = vector.load %arg6[%c0_17, %c0_18] : memref<8x128xf32, #tpu.memory_space<vmem>>, vector<8x128xf32>
      tpu.vector_store %arg6[%c0_17, %c0_18], %28 {strides = array<i32>} : memref<8x128xf32, #tpu.memory_space<vmem>>, vector<8x128xf32>,
    } else {
    }
    return
  }
  func.func @transform_0(%arg0: i32, %arg1: i32, %arg2: i32) -> (i32, i32) {
    %c0_i32 = arith.constant 0 : i32
    return %arg0, %arg2 : i32, i32
  }
  func.func @transform_1(%arg0: i32, %arg1: i32, %arg2: i32) -> (i32, i32) {
    %c0_i32 = arith.constant 0 : i32
    return %arg2, %arg1 : i32, i32
  }
  func.func @transform_2(%arg0: i32, %arg1: i32, %arg2: i32) -> (i32, i32) {
    %c0_i32 = arith.constant 0 : i32
    %c0_i32_0 = arith.constant 0 : i32
    return %c0_i32, %arg1 : i32, i32
  }
  func.func @transform_3(%arg0: i32, %arg1: i32, %arg2: i32) -> (i32, i32) {
    %c0_i32 = arith.constant 0 : i32
    return %arg0, %arg1 : i32, i32
  }
}

</mosaic_0001>

<bundles_post_ra>
// kernel: tpu_custom_call.1
= control target key start
LH: loop header
LB: loop body
LE: loop exit
PB: predicated region body
PF: predicated region fallthrough
CT: control target
= control target key end

     0   :  { %8 = vsyncpa [#allocation3], 0  ;;  %s355_s0 = inlined_call_operand.hbm [shape: f32[8,128], index: 0, kind: input, shape index: {}]   ;;  %s356_s1 = inlined_call_operand.hbm [shape: f32[128,128], index: 1, kind: input, shape index: {}]   ;;  %s357_s2 = inlined_call_operand.vmem [shape: f32[1,128], index: 2, kind: input, shape index: {}]   ;;  %s358_s3 = inlined_call_operand.hbm [shape: f32[8,128], index: 3, kind: output, shape index: {}]  }
   0x1   :  { %9 = vsyncpa [#allocation6], 0 }
   0x2   :  { %10 = vsyncpa [#allocation4], 0  ;;  %s316_s12 = smov [#allocation2]   ;;  %s317_s14 = smov [#allocation5]  }
   0x3   :  { %s17_s13 = sshll.u32 %s316_s12, 4  ;;  %s26_s15 = sshll.u32 %s317_s14, 4  ;;  %s18_s13 = int_to_ptr.vmem [resolvable:$true] %s17_s13  ;;  %s27_s15 = int_to_ptr.vmem [resolvable:$true] %s26_s15 }
   0x4   :  { %s258_s16 = scalar_lea.vmem %s18_s13, 128  ;;  %p263_p1 = scmp.lt.s32.totalorder %s18_s13, %s18_s13 }
   0x5   :  { %p259_p0 = scmp.ne.s32.totalorder %s18_s13, %s258_s16  ;;  %p264_p2 = scmp.lt.s32.totalorder %s258_s16, %s258_s16 }
   0x7   :  { %p265_p3 = por %p264_p2, %p263_p1 }
   0x9   :  { %p266_p4 = pnand %p265_p3, %p259_p0 }
   0xb   :  { %269 = shalt.err (!%p266_p4)
}
   0xc   :  { %20 = dma.hbm_to_vmem [thread:$0]  %s355_s0, 128, %s18_s13, [#allocation3]  }
   0xd   :  { %s278_s19 = scalar_lea.vmem %s27_s15, 2048  ;;  %p283_p6 = scmp.lt.s32.totalorder %s27_s15, %s27_s15 }
   0xe   :  { %p279_p5 = scmp.ne.s32.totalorder %s27_s15, %s278_s19  ;;  %p284_p7 = scmp.lt.s32.totalorder %s278_s19, %s278_s19 }
  0x10   :  { %p285_p8 = por %p284_p7, %p283_p6 }
  0x12   :  { %p286_p9 = pnand %p285_p8, %p279_p5 }
  0x14   :  { %289 = shalt.err (!%p286_p9)
}
  0x15   :  { %s318_s20 = smov 128   ;;  %s319_s21 = smov 8  }
  0x16   :  { %32 = dma.hbm_to_vmem [thread:$0]  %s356_s1, 2048, %s27_s15, [#allocation6], %s318_s20, %s318_s20, %s319_s21  }
  0x17   :  { %310 = dma.done.wait [#allocation3], 128  }
  0x18   :  { %311 = vsyncadd [#allocation3], 4294967168 }
  0x19   :  { %312 = dma.done.wait [#allocation6], 2048  }
  0x1a   :  { %313 = vsyncadd [#allocation6], 4294965248  ;;  %v320_v0 = vmov 0.0   ;;  %vm321_vm0 = vmmov 0   ;;  %v57_v1 = vld [vmem:[#allocation5 + $0x78] sm:$0xff]  ;;  %v56_v2 = vld [vmem:[#allocation5 + $0x70] sm:$0xff] }
  0x1b   :  { %204 = vmatprep.subr.mxu0 %v320_v0  ;;  %236 = vmatprep.mubr.msk.f32.mxu0 %vm321_vm0, %v320_v0  ;;  %v55_v3 = vld [vmem:[#allocation5 + $0x68] sm:$0xff]  ;;  %v54_v4 = vld [vmem:[#allocation5 + $0x60] sm:$0xff]  ;;  %v53_v5 = vld [vmem:[#allocation5 + $0x58] sm:$0xff] }
  0x1c   :  { %205 = vmatpush3.msra.mxu0 %v57_v1  ;;  %v52_v6 = vld [vmem:[#allocation5 + $0x50] sm:$0xff]  ;;  %v51_v7 = vld [vmem:[#allocation5 + $0x48] sm:$0xff]  ;;  %v50_v8 = vld [vmem:[#allocation5 + $0x40] sm:$0xff] }
  0x1d   :  { %206 = vmatprep.subr.mxu0 %v320_v0  ;;  %v49_v9 = vld [vmem:[#allocation5 + $0x38] sm:$0xff]  ;;  %v48_v10 = vld [vmem:[#allocation5 + $0x30] sm:$0xff]  ;;  %v47_v11 = vld [vmem:[#allocation5 + $0x28] sm:$0xff] }
  0x1e   :  { %207 = vmatpush3.msra.mxu0 %v56_v2  ;;  %v46_v12 = vld [vmem:[#allocation5 + $0x20] sm:$0xff]  ;;  %v45_v13 = vld [vmem:[#allocation5 + $0x18] sm:$0xff]  ;;  %v44_v14 = vld [vmem:[#allocation5 + $0x10] sm:$0xff] }
  0x1f   :  { %208 = vmatprep.subr.mxu0 %v320_v0  ;;  %v43_v15 = vld [vmem:[#allocation5 + $0x8] sm:$0xff]  ;;  %v42_v16 = vld [vmem:[#allocation5] sm:$0xff]  ;;  %v41_v17 = vld [vmem:[#allocation2] sm:$0xff] }
  0x20   :  { %209 = vmatpush3.msra.mxu0 %v55_v3  ;;  %v186_v18 = vld [vmem:[%s357_s2] ss:$0 sm:$0xff]  ;;  %s322_s2 = smov [#allocation7]  }
  0x21   :  { %210 = vmatprep.subr.mxu0 %v320_v0  ;;  %s176_s24 = sshll.u32 %s322_s2, 4  ;;  %s177_s24 = int_to_ptr.vmem [resolvable:$true] %s176_s24 }
  0x22   :  { %211 = vmatpush3.msra.mxu0 %v54_v4  ;;  %s290_s25 = scalar_lea.vmem %s177_s24, 128  ;;  %p295_p11 = scmp.lt.s32.totalorder %s177_s24, %s177_s24 }
  0x23   :  { %212 = vmatprep.subr.mxu0 %v320_v0  ;;  %p291_p10 = scmp.ne.s32.totalorder %s177_s24, %s290_s25  ;;  %p296_p12 = scmp.lt.s32.totalorder %s290_s25, %s290_s25 }
  0x24   :  { %213 = vmatpush3.msra.mxu0 %v53_v5 }
  0x25   :  { %214 = vmatprep.subr.mxu0 %v320_v0  ;;  %p297_p13 = por %p296_p12, %p295_p11 }
  0x26   :  { %215 = vmatpush3.msra.mxu0 %v52_v6 }
  0x27   :  { %216 = vmatprep.subr.mxu0 %v320_v0  ;;  %p298_p0 = pnand %p297_p13, %p291_p10 }
  0x28   :  { %217 = vmatpush3.msra.mxu0 %v51_v7 }
  0x29   :  { %218 = vmatprep.subr.mxu0 %v320_v0 }
  0x2a   :  { %219 = vmatpush3.msra.mxu0 %v50_v8 }
  0x2b   :  { %220 = vmatprep.subr.mxu0 %v320_v0 }
  0x2c   :  { %221 = vmatpush3.msra.mxu0 %v49_v9 }
  0x2d   :  { %222 = vmatprep.subr.mxu0 %v320_v0 }
  0x2e   :  { %223 = vmatpush3.msra.mxu0 %v48_v10 }
  0x2f   :  { %224 = vmatprep.subr.mxu0 %v320_v0 }
  0x30   :  { %225 = vmatpush3.msra.mxu0 %v47_v11 }
  0x31   :  { %226 = vmatprep.subr.mxu0 %v320_v0 }
  0x32   :  { %227 = vmatpush3.msra.mxu0 %v46_v12 }
  0x33   :  { %228 = vmatprep.subr.mxu0 %v320_v0 }
  0x34   :  { %229 = vmatpush3.msra.mxu0 %v45_v13 }
  0x35   :  { %230 = vmatprep.subr.mxu0 %v320_v0 }
  0x36   :  { %231 = vmatpush3.msra.mxu0 %v44_v14 }
  0x37   :  { %232 = vmatprep.subr.mxu0 %v320_v0 }
  0x38   :  { %233 = vmatpush3.msra.mxu0 %v43_v15 }
  0x39   :  { %234 = vmatprep.subr.mxu0 %v320_v0 }
  0x3a   :  { %235 = vmatpush3.msra.mxu0 %v42_v16 }
  0x3b   :  { %237 = vmatmul.mubr.f32.vlgmr.msra.gmra.mxu0 %v41_v17 }
  0xfb   :  { %v124_v19 = vpop.f32.mrf.mxu0 }
  0xfc   :  { %v151_v20 = vadd.f32 %v186_v18, %v124_v19 }
  0xfd   :  { %v238_v21 = vpop.f32.mrf.mxu0 }
  0xfe   :  { %v153_v22 = vmin.f32 %v151_v20, 20.0  ;;  %vm152_vm2 = vcmp.gt.f32.partialorder %v151_v20, 20.0 }
 0x100   :  { %v154_v23 = vmul.f32 1.442695, %v153_v22 }
 0x102   :  { %246 = vpow2.f32 %v154_v23 }
 0x10f   :  { %v247_v24 = vpop.eup %246 }
 0x110   :  { %v156_v25 = vadd.f32 1.0, %v247_v24  ;;  %v159_v26 = vmul.f32 -0.5, %v247_v24  ;;  %v162_v28 = vand.u32 2147483647, %v247_v24 }
 0x112   :  { %248 = vlog2.f32 %v156_v25  ;;  %v160_v27 = vadd.f32 1.0, %v159_v26  ;;  %vm163_vm1 = vcmp.lt.f32.partialorder %v162_v28, 0.0004427343 }
 0x114   :  { %v161_v31 = vmul.f32 %v247_v24, %v160_v27 }
 0x11f   :  { %v249_v29 = vpop.eup %248 }
 0x120   :  { %v158_v30 = vmul.f32 0.6931472, %v249_v29 }
 0x122   :  { %v164_v32 = vsel %vm163_vm1, %v161_v31, %v158_v30 }
 0x123   :  { %v165_v33 = vsel %vm152_vm2, %v151_v20, %v164_v32 }
 0x124   :  { %v166_v34 = vadd.f32 0.01, %v165_v33 }
 0x126   :  { %v167_v35 = vmax.f32 %v166_v34, 0.01 }
 0x128   :  { %v168_v36 = vmin.f32 %v167_v35, 100.0 }
 0x12a   :  { %169 = vst [vmem:[#allocation7] sm:$0xff] %v168_v36 }
 0x12b   :  { %301 = shalt.err (!%p298_p0)
}
 0x12c   :  { %179 = dma.vmem_to_hbm [thread:$0]  %s177_s24, 128, %s358_s3, [#allocation4]  }
 0x12d   :  { %314 = dma.done.wait [#allocation4], 128  }
 0x12e   :  { %315 = vsyncadd [#allocation4], 4294967168 }
 0x12f   :  { %183 = vsyncpa [#allocation3], 1 }
 0x130   :  { %184 = vsyncpa [#allocation6], 1 }
 0x131   :  { %185 = vsyncpa [#allocation4], 1 }

</bundles_post_ra>
